<compile_context>
chip_gen: v6e
topology: v6e:2x2x1
jax: 0.10.0
libtpu: 0.0.40
codegen_flags: <defaults>
</compile_context>

<pallas_src>
import functools

import jax
import jax.numpy as jnp
from jax import lax
from jax.experimental import pallas as pl
from jax.experimental.pallas import tpu as pltpu


def _round_up(x, m):
    return ((x + m - 1) // m) * m


def _softplus(x):
    # Match torch.nn.Softplus(beta=1, threshold=20):
    #   x                 if x > 20
    #   log(1 + exp(x))   otherwise
    safe = jnp.minimum(x, 20.0)
    return jnp.where(x > 20.0, x, jnp.log1p(jnp.exp(safe)))


def _icnn_kernel(y_ref, wcat_ref, bcat_ref, wz1_ref, out_ref, *, hidden):
    y = y_ref[...]                                       # (TB, IN), batch on sublanes
    # t[h, b] = sum_k Wcat[h, k] * y[b, k]  ->  (SUB, TB), batch on lanes.
    # Contracting both operands on their minor dim is the native "A @ B^T"
    # MXU form (same as q @ k^T in attention) -- no transpose of y needed.
    t = lax.dot_general(
        wcat_ref[...], y,
        dimension_numbers=(((1,), (1,)), ((), ())),
        preferred_element_type=jnp.float32,
    ) + bcat_ref[...]                                    # lane-broadcast bias (SUB, 1)

    # Rows 0..hidden-1 are the z1 pre-activations: softplus only this
    # 8-aligned sublane slice (no iota/where mask over the padded rows).
    sp = _softplus(t[:hidden, :])                        # (hidden, TB)
    # Row `hidden` carries the layer-2 y-path (y @ Wy1^T + by1): passes raw.
    y_path = t[hidden:hidden + 1, :]                     # (1, TB)

    # Layer 2 off the MXU: VPU multiply + sublane (XLU) reduce over 24 rows.
    z2_pre = jnp.sum(sp * wz1_ref[...], axis=0, keepdims=True) + y_path
    out_ref[...] = _softplus(z2_pre).astype(out_ref.dtype)   # lane-dense store


def icnn_forward(y, w0, b0, wz1, wy1, by1, *, tile_b=4096,
                 vmem_budget_bytes=40 * 1024 * 1024):
    """ICNN forward.

    y  : (B, input_num)            f32 or bf16 (pass bf16 only if y already
                                   lives in HBM as bf16 -- no cast is done here)
    w0 : (hidden, input_num)       linear_y0.weight  (torch layout)
    b0 : (hidden,)                 linear_y0.bias
    wz1: (1, hidden)               linear_z1.weight  (no bias)
    wy1: (1, input_num)            linear_y1.weight
    by1: (1,)                      linear_y1.bias
    Returns (B, 1) f32.
    """
    B, input_num = y.shape
    hidden = w0.shape[0]
    sub = _round_up(hidden + 1, 8)           # 24 hidden + 1 y-path row -> 32 sublanes
    itemsize = jnp.dtype(y.dtype).itemsize

    # Fused, padded parameter blocks (biases folded in -- no separate (1,1) DMA).
    wcat = jnp.zeros((sub, input_num), jnp.float32)
    wcat = wcat.at[:hidden].set(w0.astype(jnp.float32))
    wcat = wcat.at[hidden].set(wy1[0].astype(jnp.float32))
    wcat = wcat.astype(y.dtype)              # MXU operand dtype follows y (bf16 iff y is bf16)

    bcat = jnp.zeros((sub, 1), jnp.float32)
    bcat = bcat.at[:hidden, 0].set(b0.astype(jnp.float32))
    bcat = bcat.at[hidden, 0].set(by1[0].astype(jnp.float32))

    wz1c = wz1.reshape(hidden)[:, None].astype(jnp.float32)   # (hidden, 1)

    # --- Batch tile selection, budgeted against *lane-padded* VMEM usage. ---
    # A (tb, 48) y block is stored as (tb, 128) tiles => tb*128*itemsize per
    # buffer, x2 for double-buffering; plus ~6 f32 (sub, tb) epilogue temps.
    def _vmem_est(tb_):
        lanes_in = max(_round_up(input_num, 128), 128)
        y_bytes = 2 * tb_ * lanes_in * itemsize
        epi_bytes = 6 * sub * tb_ * 4
        out_bytes = 2 * max(tb_, 128) * 4
        return y_bytes + epi_bytes + out_bytes

    tb = _round_up(max(8, min(tile_b, B)), 8)
    while _vmem_est(tb) > vmem_budget_bytes and tb > 128:
        tb = max(128, tb // 2)
    num_blocks = pl.cdiv(B, tb)
    if num_blocks > 1:
        tb = _round_up(tb, 128)              # multi-block => 128-lane-dense out blocks
        num_blocks = pl.cdiv(B, tb)
    b_out = num_blocks * tb                  # output slab padded to whole blocks (4 B/row)

    flops = 2 * B * input_num * sub + 4 * B * hidden
    transcendentals = 2 * B * (hidden + 1)
    bytes_accessed = (y.size * itemsize
                      + wcat.size * wcat.dtype.itemsize
                      + 4 * (bcat.size + wz1c.size + B))

    out = pl.pallas_call(
        functools.partial(_icnn_kernel, hidden=hidden),
        out_shape=jax.ShapeDtypeStruct((1, b_out), jnp.float32),
        grid=(num_blocks,),
        in_specs=[
            # y tile, pipelined; last block may be ragged (no wrapper-side pad:
            # out-of-range lanes hold garbage, per-lane independent, sliced off).
            pl.BlockSpec((tb, input_num), lambda i: (i, 0)),
            pl.BlockSpec((sub, input_num), lambda i: (0, 0)),  # resident fused weights
            pl.BlockSpec((sub, 1), lambda i: (0, 0)),          # resident fused biases
            pl.BlockSpec((hidden, 1), lambda i: (0, 0)),       # resident layer-2 vector
        ],
        out_specs=pl.BlockSpec((1, tb), lambda i: (0, i)),     # lane-dense output slab
        compiler_params=pltpu.CompilerParams(
            dimension_semantics=("parallel",),
            vmem_limit_bytes=int(min(max(_vmem_est(tb) * 5 // 4, 16 << 20), 56 << 20)),
        ),
        cost_estimate=pl.CostEstimate(
            flops=int(flops),
            transcendentals=int(transcendentals),
            bytes_accessed=int(bytes_accessed)),
    )(y, wcat, bcat, wz1c)

    return out[0, :B].reshape(B, 1)


def init_params(key, input_num=48, hidden_num=24):
    """PyTorch nn.Linear-style uniform init, torch (out_features, in_features) layout."""
    k0, k1, k2, k3, k4 = jax.random.split(key, 5)
    bnd_y = 1.0 / jnp.sqrt(input_num)
    bnd_z = 1.0 / jnp.sqrt(hidden_num)
    w0 = jax.random.uniform(k0, (hidden_num, input_num), jnp.float32, -bnd_y, bnd_y)
    b0 = jax.random.uniform(k1, (hidden_num,), jnp.float32, -bnd_y, bnd_y)
    wz1 = jax.random.uniform(k2, (1, hidden_num), jnp.float32, -bnd_z, bnd_z)
    wy1 = jax.random.uniform(k3, (1, input_num), jnp.float32, -bnd_y, bnd_y)
    by1 = jax.random.uniform(k4, (1,), jnp.float32, -bnd_y, bnd_y)
    return w0, b0, wz1, wy1, by1


def icnn_reference(y, w0, b0, wz1, wy1, by1):
    y = y.astype(jnp.float32)
    z1 = jax.nn.softplus(y @ w0.T + b0)
    return jax.nn.softplus(z1 @ wz1.T + y @ wy1.T + by1)


if __name__ == "__main__":
    key = jax.random.PRNGKey(0)
    ky, ky2, kp = jax.random.split(key, 3)

    batch, input_num, hidden_num = 8, 48, 24
    y = jax.random.normal(ky, (batch, input_num), jnp.float32)
    params = init_params(kp, input_num, hidden_num)

    # Small-batch path (single grid step).
    out = jax.block_until_ready(icnn_forward(y, *params))
    ref = icnn_reference(y, *params)
    assert out.shape == (batch, 1)
    assert jnp.allclose(out, ref, atol=1e-5, rtol=1e-5)

    # Multi-block path: grid > 1, batch not a tile multiple -> ragged last
    # block (no wrapper-side pad), padded lanes sliced off.
    y2 = jax.random.normal(ky2, (300, input_num), jnp.float32)
    out2 = jax.block_until_ready(icnn_forward(y2, *params, tile_b=128))
    ref2 = icnn_reference(y2, *params)
    assert out2.shape == (300, 1)
    assert jnp.allclose(out2, ref2, atol=1e-5, rtol=1e-5)

    # bf16-resident y: MXU operands bf16, accumulation/softplus stay f32.
    out_bf16 = jax.block_until_ready(icnn_forward(y.astype(jnp.bfloat16), *params))
    assert jnp.allclose(out_bf16, ref, atol=5e-2, rtol=5e-2)

    print("KERNEL_OK")
</pallas_src>

<mosaic_0001>
module attributes {stable_mosaic.version = 11 : i64} {
  func.func @_icnn_kernel(%arg0: i32, %arg1: memref<8x48xf32, #tpu.memory_space<vmem>>, %arg2: memref<32x48xf32, #tpu.memory_space<vmem>>, %arg3: memref<32x1xf32, #tpu.memory_space<vmem>>, %arg4: memref<24x1xf32, #tpu.memory_space<vmem>>, %arg5: memref<1x8xf32, #tpu.memory_space<vmem>>) attributes {dimension_semantics = [#tpu.dimension_semantics<parallel>], iteration_bounds = array<i64: 1>, scalar_prefetch = 0 : i64, scratch_operands = 0 : i64, tpu.core_type = #tpu.core_type<tc>, window_params = [{transform_indices = @transform_0, window_bounds = array<i64: 8, 48>}, {pipeline_mode = #tpu.pipeline_mode<synchronous>, transform_indices = @transform_1, window_bounds = array<i64: 32, 48>}, {pipeline_mode = #tpu.pipeline_mode<synchronous>, transform_indices = @transform_2, window_bounds = array<i64: 32, 1>}, {pipeline_mode = #tpu.pipeline_mode<synchronous>, transform_indices = @transform_3, window_bounds = array<i64: 24, 1>}, {transform_indices = @transform_4, window_bounds = array<i64: 1, 8>}]} {
    %c0 = arith.constant 0 : index
    %c0_0 = arith.constant 0 : index
    %0 = vector.load %arg1[%c0, %c0_0] : memref<8x48xf32, #tpu.memory_space<vmem>>, vector<8x48xf32>
    %c0_1 = arith.constant 0 : index
    %c0_2 = arith.constant 0 : index
    %1 = vector.load %arg2[%c0_1, %c0_2] : memref<32x48xf32, #tpu.memory_space<vmem>>, vector<32x48xf32>
    %cst = arith.constant dense<0.000000e+00> : vector<32x8xf32>
    %2 = tpu.matmul %1, %0, %cst {dimension_numbers = #tpu.dot_dimension_numbers<[1], [1], [0], [0], [0, 0, 1, 0], [], []>} : vector<32x48xf32>, vector<8x48xf32>, vector<32x8xf32> -> vector<32x8xf32>
    %c0_3 = arith.constant 0 : index
    %c0_4 = arith.constant 0 : index
    %3 = vector.load %arg3[%c0_3, %c0_4] : memref<32x1xf32, #tpu.memory_space<vmem>>, vector<32x1xf32>
    %4 = vector.broadcast %3 : vector<32x1xf32> to vector<32x8xf32>
    %5 = arith.addf %2, %4 : vector<32x8xf32>
    %6 = vector.extract_strided_slice %5 {offsets = [0, 0], sizes = [24, 8], strides = [1, 1]} : vector<32x8xf32> to vector<24x8xf32>
    %cst_5 = arith.constant 2.000000e+01 : f32
    %7 = vector.broadcast %cst_5 : f32 to vector<24x8xf32>
    %8 = arith.minimumf %6, %7 : vector<24x8xf32>
    %cst_6 = arith.constant 2.000000e+01 : f32
    %9 = vector.broadcast %cst_6 : f32 to vector<24x8xf32>
    %10 = arith.cmpf ogt, %6, %9 : vector<24x8xf32>
    %11 = math.exp %8 : vector<24x8xf32>
    %12 = math.log1p %11 : vector<24x8xf32>
    %13 = arith.select %10, %6, %12 : vector<24x8xi1>, vector<24x8xf32>
    %14 = vector.extract_strided_slice %5 {offsets = [24, 0], sizes = [1, 8], strides = [1, 1]} : vector<32x8xf32> to vector<1x8xf32>
    %c0_7 = arith.constant 0 : index
    %c0_8 = arith.constant 0 : index
    %15 = vector.load %arg4[%c0_7, %c0_8] : memref<24x1xf32, #tpu.memory_space<vmem>>, vector<24x1xf32>
    %16 = vector.broadcast %15 : vector<24x1xf32> to vector<24x8xf32>
    %17 = arith.mulf %13, %16 : vector<24x8xf32>
    %cst_9 = arith.constant dense<0.000000e+00> : vector<8xf32>
    %18 = vector.multi_reduction <add>, %17, %cst_9 [0] : vector<24x8xf32> to vector<8xf32>
    %19 = vector.shape_cast %18 : vector<8xf32> to vector<1x8xf32>
    %20 = arith.addf %19, %14 : vector<1x8xf32>
    %cst_10 = arith.constant 2.000000e+01 : f32
    %21 = vector.broadcast %cst_10 : f32 to vector<1x8xf32>
    %22 = arith.minimumf %20, %21 : vector<1x8xf32>
    %cst_11 = arith.constant 2.000000e+01 : f32
    %23 = vector.broadcast %cst_11 : f32 to vector<1x8xf32>
    %24 = arith.cmpf ogt, %20, %23 : vector<1x8xf32>
    %25 = math.exp %22 : vector<1x8xf32>
    %26 = math.log1p %25 : vector<1x8xf32>
    %27 = arith.select %24, %20, %26 : vector<1x8xi1>, vector<1x8xf32>
    %c0_12 = arith.constant 0 : index
    %c0_13 = arith.constant 0 : index
    %28 = vector.load %arg5[%c0_12, %c0_13] : memref<1x8xf32, #tpu.memory_space<vmem>>, vector<1x8xf32>
    tpu.vector_store %arg5[%c0_12, %c0_13], %27 {strides = array<i32>} : memref<1x8xf32, #tpu.memory_space<vmem>>, vector<1x8xf32>,
    return
  }
  func.func @transform_0(%arg0: i32) -> (i32, i32) {
    %c0_i32 = arith.constant 0 : i32
    %c0_i32_0 = arith.constant 0 : i32
    return %arg0, %c0_i32 : i32, i32
  }
  func.func @transform_1(%arg0: i32) -> (i32, i32) {
    %c0_i32 = arith.constant 0 : i32
    %c0_i32_0 = arith.constant 0 : i32
    %c0_i32_1 = arith.constant 0 : i32
    return %c0_i32, %c0_i32_0 : i32, i32
  }
  func.func @transform_2(%arg0: i32) -> (i32, i32) {
    %c0_i32 = arith.constant 0 : i32
    %c0_i32_0 = arith.constant 0 : i32
    %c0_i32_1 = arith.constant 0 : i32
    return %c0_i32, %c0_i32_0 : i32, i32
  }
  func.func @transform_3(%arg0: i32) -> (i32, i32) {
    %c0_i32 = arith.constant 0 : i32
    %c0_i32_0 = arith.constant 0 : i32
    %c0_i32_1 = arith.constant 0 : i32
    return %c0_i32, %c0_i32_0 : i32, i32
  }
  func.func @transform_4(%arg0: i32) -> (i32, i32) {
    %c0_i32 = arith.constant 0 : i32
    %c0_i32_0 = arith.constant 0 : i32
    return %c0_i32, %arg0 : i32, i32
  }
}

</mosaic_0001>

<bundles_post_ra>
// kernel: tpu_custom_call.1
= control target key start
LH: loop header
LB: loop body
LE: loop exit
PB: predicated region body
PF: predicated region fallthrough
CT: control target
= control target key end

     0   :  { %vm47_vm0 = vcmask 392192   ;;  %v316_v7 = vmov 0   ;;  %s393_s0 = inlined_call_operand.vmem [shape: f32[8,48], index: 0, kind: input, shape index: {}]   ;;  %s394_s1 = inlined_call_operand.vmem [shape: f32[32,48], index: 1, kind: input, shape index: {}]   ;;  %s395_s2 = inlined_call_operand.vmem [shape: f32[32,1], index: 2, kind: input, shape index: {}]   ;;  %s396_s3 = inlined_call_operand.vmem [shape: f32[24,1], index: 3, kind: input, shape index: {}]   ;;  %s397_s4 = inlined_call_operand.hbm [shape: f32[1,8], index: 4, kind: output, shape index: {}]  }
   0x1   :  { %v18_v0 = vld [vmem:[%s393_s0] sm:$0xff]  ;;  %v21_v2 = vld [vmem:[%s394_s1 + $0x10] sm:$0xff]  ;;  %v20_v3 = vld [vmem:[%s394_s1 + $0x8] sm:$0xff]  ;;  %276 = vset.pattern.permute.xlu0 %v316_v7  ;;  %277 = vset.pattern.permute.xlu1 %v316_v7 }
   0x2   :  { %v19_v1 = vld [vmem:[%s394_s1] sm:$0xff]  ;;  %264 = vmatprep.subr.msk.mxu0 %vm47_vm0, %v18_v0  ;;  %272 = vmatprep.subr.msk.mxu1 %vm47_vm0, %v18_v0  ;;  %v22_v4 = vld [vmem:[%s394_s1 + $0x18] sm:$0xff]  ;;  %v25_v6 = vld [vmem:[%s395_s2 + $0x10] sm:$0xff] }
   0x3   :  { %265 = vmatpush3.xpose.msk.msra.mxu0 %vm47_vm0, %v18_v0  ;;  %273 = vmatpush3.xpose.msk.msra.mxu1 %vm47_vm0, %v18_v0  ;;  %v23_v5 = vld [vmem:[%s395_s2] sm:$0xff] }
   0x4   :  { %266 = vmatprep.mubr.msk.f32.mxu0 %vm47_vm0, %v19_v1  ;;  %269 = vmatprep.mubr.msk.f32.mxu1 %vm47_vm0, %v21_v2 }
   0x5   :  { %9 = vsyncpa [#allocation3], 0  ;;  %29 = vperm.xlu0 %276, %v23_v5   ;;  %39 = vperm.xlu1 %277, %v25_v6   ;;  %v24_v8 = vld [vmem:[%s395_s2 + $0x8] sm:$0xff]  ;;  %v190_v9 = vld [vmem:[%s396_s3] sm:$0xff]  ;;  %vm211_vm6 = vcmask 64512   ;;  %vm238_vm9 = vcmask 57344  }
   0x6   :  { %267 = vmatmul.mubr.msk.f32.vlgmr.msra.gmra.mxu0 %vm47_vm0, %v20_v3  ;;  %270 = vmatmul.mubr.msk.f32.vlgmr.msra.gmra.mxu1 %vm47_vm0, %v22_v4  ;;  %v191_v10 = vld [vmem:[%s396_s3 + $0x8] sm:$0xff]  ;;  %v192_v11 = vld [vmem:[%s396_s3 + $0x10] sm:$0xff]  ;;  %v26_v12 = vld [vmem:[%s395_s2 + $0x18] sm:$0xff]  ;;  %s317_s2 = smov [#allocation2]  }
   0x7   :  { %s246_s3 = sshll.u32 %s317_s2, 4  ;;  %s247_s3 = int_to_ptr.vmem [resolvable:$true] %s246_s3 }
   0x8   :  { %s294_s11 = scalar_lea.vmem %s247_s3, 16  ;;  %s298_s12 = scalar_lea.vmem %s247_s3, 32 }
   0x9   :  { %34 = vperm.xlu0 %276, %v24_v8   ;;  %195 = vperm.xlu1 %277, %v190_v9   ;;  %p295_p0 = scmp.ne.s32.totalorder %s247_s3, %s294_s11  ;;  %p299_p1 = scmp.lt.s32.totalorder %s247_s3, %s247_s3 }
   0xa   :  { %p300_p2 = scmp.lt.s32.totalorder %s298_s12, %s294_s11 }
   0xc   :  { %p301_p3 = por %p300_p2, %p299_p1 }
   0xd   :  { %200 = vperm.xlu0 %276, %v191_v10   ;;  %205 = vperm.xlu1 %277, %v192_v11  }
   0xe   :  { %p302_p4 = pnand %p301_p3, %p295_p0 }
  0x11   :  { %44 = vperm.xlu0 %276, %v26_v12  }
  0x80   :  { %v30_v13 = vpop.permute.xlu0 %29  ;;  %v40_v17 = vpop.permute.xlu1 %39 }
  0x84   :  { %v35_v14 = vpop.permute.xlu0 %34  ;;  %v196_v44 = vpop.permute.xlu1 %195 }
  0x88   :  { %v201_v53 = vpop.permute.xlu0 %200  ;;  %v206_v62 = vpop.permute.xlu1 %205 }
  0x8c   :  { %v45_v11 = vpop.permute.xlu0 %44 }
  0xc6   :  { %v268_v15 = vpop.f32.mrf.mxu0  ;;  %v387_v16 = vpop.f32.mrf.mxu1 }
  0xc7   :  { %v135_v18 = vadd.f32 %v268_v15, %v35_v14  ;;  %v145_v12 = vadd.f32 %v387_v16, %v45_v11 }
  0xc8   :  { %v129_v19 = vpop.f32.mrf.mxu0  ;;  %v139_v20 = vpop.f32.mrf.mxu1 }
  0xc9   :  { %v149_v21 = vmin.f32 %v135_v18, 20.0  ;;  %v130_v22 = vadd.f32 %v129_v19, %v30_v13  ;;  %v140_v23 = vadd.f32 %v139_v20, %v40_v17  ;;  %vm152_vm2 = vcmp.gt.f32.partialorder %v135_v18, 20.0 }
  0xcb   :  { %v156_v24 = vmul.f32 1.442695, %v149_v21  ;;  %v148_v25 = vmin.f32 %v130_v22, 20.0  ;;  %v150_v26 = vmin.f32 %v140_v23, 20.0  ;;  %vm151_vm4 = vcmp.gt.f32.partialorder %v130_v22, 20.0 }
  0xcc   :  { %vm153_vm7 = vcmp.gt.f32.partialorder %v140_v23, 20.0 }
  0xcd   :  { %278 = vpow2.f32 %v156_v24  ;;  %v154_v27 = vmul.f32 1.442695, %v148_v25  ;;  %v158_v28 = vmul.f32 1.442695, %v150_v26 }
  0xcf   :  { %280 = vpow2.f32 %v154_v27 }
  0xd0   :  { %282 = vpow2.f32 %v158_v28 }
  0xda   :  { %v279_v29 = vpop.eup %278 }
  0xdb   :  { %v169_v30 = vadd.f32 1.0, %v279_v29  ;;  %v172_v35 = vmul.f32 -0.5, %v279_v29  ;;  %v175_v39 = vand.u32 2147483647, %v279_v29 }
  0xdc   :  { %v281_v31 = vpop.eup %280 }
  0xdd   :  { %v283_v32 = vpop.eup %282  ;;  %284 = vlog2.f32 %v169_v30  ;;  %v160_v33 = vadd.f32 1.0, %v281_v31  ;;  %v163_v36 = vmul.f32 -0.5, %v281_v31  ;;  %v173_v38 = vadd.f32 1.0, %v172_v35 }
  0xde   :  { %v178_v34 = vadd.f32 1.0, %v283_v32  ;;  %v181_v37 = vmul.f32 -0.5, %v283_v32  ;;  %v166_v42 = vand.u32 2147483647, %v281_v31  ;;  %v184_v47 = vand.u32 2147483647, %v283_v32 }
  0xdf   :  { %286 = vlog2.f32 %v160_v33  ;;  %v164_v40 = vadd.f32 1.0, %v163_v36  ;;  %v174_v46 = vmul.f32 %v279_v29, %v173_v38  ;;  %vm176_vm1 = vcmp.lt.f32.partialorder %v175_v39, 0.0004427343 }
  0xe0   :  { %288 = vlog2.f32 %v178_v34  ;;  %v182_v43 = vadd.f32 1.0, %v181_v37  ;;  %vm167_vm3 = vcmp.lt.f32.partialorder %v166_v42, 0.0004427343  ;;  %vm185_vm5 = vcmp.lt.f32.partialorder %v184_v47, 0.0004427343 }
  0xe1   :  { %v165_v52 = vmul.f32 %v281_v31, %v164_v40 }
  0xe2   :  { %v183_v56 = vmul.f32 %v283_v32, %v182_v43 }
  0xea   :  { %v285_v41 = vpop.eup %284 }
  0xeb   :  { %v171_v45 = vmul.f32 0.6931472, %v285_v41 }
  0xec   :  { %v287_v48 = vpop.eup %286 }
  0xed   :  { %v289_v49 = vpop.eup %288  ;;  %v177_v50 = vsel %vm176_vm1, %v174_v46, %v171_v45  ;;  %v162_v51 = vmul.f32 0.6931472, %v287_v48 }
  0xee   :  { %v188_v54 = vsel %vm152_vm2, %v135_v18, %v177_v50  ;;  %v180_v55 = vmul.f32 0.6931472, %v289_v49 }
  0xef   :  { %v209_v57 = vmul.f32 %v201_v53, %v188_v54  ;;  %v168_v58 = vsel %vm167_vm3, %v165_v52, %v162_v51 }
  0xf0   :  { %v187_v59 = vsel %vm151_vm4, %v130_v22, %v168_v58  ;;  %v186_v60 = vsel %vm185_vm5, %v183_v56, %v180_v55 }
  0xf1   :  { %v208_v61 = vmul.f32 %v196_v44, %v187_v59  ;;  %v189_v63 = vsel %vm153_vm7, %v140_v23, %v186_v60  ;;  %v213_v2 = vsel %vm211_vm6, %v209_v57, 0.0 }
  0xf2   :  { %v210_v0 = vmul.f32 %v206_v62, %v189_v63 }
  0xf3   :  { %v212_v1 = vsel %vm211_vm6, %v208_v61, 0.0 }
  0xf4   :  { %v214_v3 = vadd.f32 %v213_v2, %v212_v1  ;;  %v215_v4 = vsel %vm211_vm6, %v210_v0, 0.0 }
  0xf6   :  { %v216_v5 = vadd.f32 %v215_v4, %v214_v3 }
  0xf8   :  { %v217_v6 = vrot.slane %v216_v5, 4 }
  0xfa   :  { %v218_v7 = vadd.f32 %v217_v6, %v216_v5 }
  0xfc   :  { %v219_v8 = vrot.slane %v218_v7, 2 }
  0xfe   :  { %v220_v9 = vadd.f32 %v219_v8, %v218_v7 }
 0x100   :  { %v221_v10 = vrot.slane %v220_v9, 1 }
 0x102   :  { %v222_v13 = vadd.f32 %v221_v10, %v220_v9 }
 0x104   :  { %v223_v14 = vadd.f32 %v222_v13, %v145_v12 }
 0x106   :  { %v224_v15 = vmin.f32 %v223_v14, 20.0  ;;  %vm225_vm10 = vcmp.gt.f32.partialorder %v223_v14, 20.0 }
 0x108   :  { %v226_v17 = vmul.f32 1.442695, %v224_v15 }
 0x10a   :  { %290 = vpow2.f32 %v226_v17 }
 0x117   :  { %v291_v18 = vpop.eup %290 }
 0x118   :  { %v228_v19 = vadd.f32 1.0, %v291_v18  ;;  %v231_v20 = vmul.f32 -0.5, %v291_v18  ;;  %v234_v22 = vand.u32 2147483647, %v291_v18 }
 0x11a   :  { %292 = vlog2.f32 %v228_v19  ;;  %v232_v21 = vadd.f32 1.0, %v231_v20  ;;  %vm235_vm8 = vcmp.lt.f32.partialorder %v234_v22, 0.0004427343 }
 0x11c   :  { %v233_v25 = vmul.f32 %v291_v18, %v232_v21 }
 0x127   :  { %v293_v23 = vpop.eup %292 }
 0x128   :  { %v230_v24 = vmul.f32 0.6931472, %v293_v23 }
 0x12a   :  { %v236_v16 = vsel %vm235_vm8, %v233_v25, %v230_v24 }
 0x12b   :  { %v237_v26 = vsel %vm225_vm10, %v223_v14, %v236_v16 }
 0x12c   :  { %239 = vst.msk [vmem:[#allocation2] sm:$0x1] %vm238_vm9, %v237_v26 }
 0x12d   :  { %305 = shalt.err (!%p302_p4)
}
 0x12e   :  { %249 = dma.vmem_to_hbm [thread:$0]  %s247_s3, 16, %s397_s4, [#allocation3]  }
 0x12f   :  { %314 = dma.done.wait [#allocation3], 16  }
 0x130   :  { %315 = vsyncadd [#allocation3], 4294967280 }
 0x131   :  { %253 = vsyncpa [#allocation3], 1 }

</bundles_post_ra>
